<compile_context>
chip_gen: v6e
topology: v6e:2x2x1
jax: 0.10.0
libtpu: 0.0.40
codegen_flags: <defaults>
</compile_context>

<pallas_src>
import functools

import jax
import jax.numpy as jnp
from jax.experimental import pallas as pl
from jax.experimental.pallas import tpu as pltpu


def _round_up(x, m):
    return ((x + m - 1) // m) * m


def _sublane_multiple(dtype):
    # Packed sublanes per vreg: f32 -> 8, bf16 -> 16, int8/fp8 -> 32.
    return max(8, 32 // jnp.dtype(dtype).itemsize)


def _auto_config(D):
    """Generation-dependent tile defaults + VMEM budget."""
    try:
        vmem_cap = pltpu.get_tpu_info().vmem_capacity_bytes
    except Exception:
        vmem_cap = 128 * 1024 * 1024
    if vmem_cap <= 64 * 1024 * 1024:
        # v7x-class: 64 MiB per TensorCore -- smaller hidden tile, tight budget.
        tm, th = 512, 256
        vmem_limit = min(vmem_cap - 8 * 1024 * 1024, 52 * 1024 * 1024)
    else:
        # v5e / v6e: 128 MiB per TensorCore -- go big on both tiles.
        tm = 1024 if D <= 4096 else 512
        th = 1024
        vmem_limit = min(int(vmem_cap * 0.8), 100 * 1024 * 1024)
    return tm, th, int(vmem_limit)


def swiglu_kernel_single(x_ref, wu_ref, wv_ref, wout_ref, o_ref):
    """Whole hidden dim in one tile: no accumulator, write result directly."""
    x = x_ref[...]                                                     # (tm, D)
    u = jnp.dot(x, wu_ref[...], preferred_element_type=jnp.float32)   # (tm, th)
    v = jnp.dot(x, wv_ref[...], preferred_element_type=jnp.float32)   # (tm, th)
    gated = (u * jax.nn.sigmoid(u)) * v                                # f32 VPU+EUP
    o_ref[...] = jnp.dot(gated.astype(wout_ref.dtype), wout_ref[...],
                         preferred_element_type=jnp.float32).astype(o_ref.dtype)


def swiglu_kernel_multi(x_ref, wu_ref, wv_ref, wout_ref, o_ref, acc_ref):
    """One (token-tile, hidden-tile) step:
       acc[m, :] += (silu(x @ Wu_h) * (x @ Wv_h)) @ Wout_h
    """
    h = pl.program_id(1)

    @pl.when(h == 0)
    def _():
        acc_ref[...] = jnp.zeros_like(acc_ref)

    x = x_ref[...]                                                     # (tm, D)
    u = jnp.dot(x, wu_ref[...], preferred_element_type=jnp.float32)   # (tm, th)
    v = jnp.dot(x, wv_ref[...], preferred_element_type=jnp.float32)   # (tm, th)
    gated = (u * jax.nn.sigmoid(u)) * v
    acc_ref[...] += jnp.dot(gated.astype(wout_ref.dtype), wout_ref[...],
                            preferred_element_type=jnp.float32)        # (tm, D)

    @pl.when(h == pl.num_programs(1) - 1)
    def _():
        o_ref[...] = acc_ref[...].astype(o_ref.dtype)


@functools.partial(jax.jit, static_argnames=("tm", "th", "vmem_limit_bytes"))
def _swiglu_impl(x2, w_uv, w_out, *, tm, th, vmem_limit_bytes):
    M, D = x2.shape
    H = w_out.shape[0]
    dtype = x2.dtype
    itemsize = jnp.dtype(dtype).itemsize
    w_itemsize = jnp.dtype(w_uv.dtype).itemsize

    # Zero-cost XLA slices (matches torch.chunk(uv, 2, dim=-1)).
    w_u = w_uv[:, :H]
    w_v = w_uv[:, H:]

    # ---- Token tile ---------------------------------------------------------
    sub = _sublane_multiple(dtype)
    tm_eff = min(tm, _round_up(M, sub))
    # Keep >= 2 steps on the parallel axis when M allows it, so both v7x
    # TensorCores get work (harmless on single-TC v5e/v6e).
    if M >= 2 * sub and -(-M // tm_eff) < 2:
        tm_eff = _round_up(-(-M // 2), sub)

    # ---- Hidden tile --------------------------------------------------------
    th_eff = min(th, H)

    # ---- Fit working set into the VMEM budget -------------------------------
    # 2x input buf + 6 weight bufs (Wu/Wv/Wout double-buffered) + 2 out bufs
    # + f32 accumulator + the compiler-materialized u/v/gated f32 temporaries.
    def vmem_bytes(tm_e, th_e):
        return (2 * tm_e * D * itemsize
                + 6 * D * th_e * w_itemsize
                + 2 * tm_e * D * itemsize
                + tm_e * D * 4
                + 3 * tm_e * th_e * 4)

    while (th_eff > 256 and th_eff % 256 == 0
           and vmem_bytes(tm_eff, th_eff) > vmem_limit_bytes):
        th_eff //= 2
    while tm_eff > 2 * sub and vmem_bytes(tm_eff, th_eff) > vmem_limit_bytes:
        tm_eff = max(sub, _round_up(tm_eff // 2, sub))

    # ---- Pad M / H up to tile multiples (padded rows/cols contribute zero) --
    Mp = _round_up(M, tm_eff)
    Hp = _round_up(H, th_eff)
    if Mp != M:
        x2 = jnp.pad(x2, ((0, Mp - M), (0, 0)))
    if Hp != H:
        w_u = jnp.pad(w_u, ((0, 0), (0, Hp - H)))
        w_v = jnp.pad(w_v, ((0, 0), (0, Hp - H)))
        w_out_p = jnp.pad(w_out, ((0, Hp - H), (0, 0)))
    else:
        w_out_p = w_out

    grid_m = Mp // tm_eff
    grid_h = Hp // th_eff
    grid = (grid_m, grid_h)

    # Weights are re-streamed once per token tile.
    cost = pl.CostEstimate(
        flops=6 * Mp * D * Hp,
        transcendentals=Mp * Hp,
        bytes_accessed=(Mp * D * itemsize                          # x
                        + grid_m * 2 * D * Hp * w_itemsize         # Wu, Wv
                        + grid_m * Hp * D * w_itemsize             # Wout
                        + Mp * D * itemsize),                      # out
    )

    if grid_h == 1:
        kernel = swiglu_kernel_single
        scratch = []
    else:
        kernel = swiglu_kernel_multi
        scratch = [pltpu.VMEM((tm_eff, D), jnp.float32)]

    out2 = pl.pallas_call(
        kernel,
        out_shape=jax.ShapeDtypeStruct((Mp, D), dtype),
        grid_spec=pltpu.PrefetchScalarGridSpec(
            num_scalar_prefetch=0,
            grid=grid,
            in_specs=[
                pl.BlockSpec((tm_eff, D), lambda i, h: (i, 0)),     # x tile
                pl.BlockSpec((D, th_eff), lambda i, h: (0, h)),     # Wu tile
                pl.BlockSpec((D, th_eff), lambda i, h: (0, h)),     # Wv tile
                pl.BlockSpec((th_eff, D), lambda i, h: (h, 0)),     # Wout tile
            ],
            out_specs=pl.BlockSpec((tm_eff, D), lambda i, h: (i, 0)),
            scratch_shapes=scratch,
        ),
        compiler_params=pltpu.CompilerParams(
            dimension_semantics=("parallel", "arbitrary"),
            vmem_limit_bytes=vmem_limit_bytes,
        ),
        cost_estimate=cost,
    )(x2, w_u, w_v, w_out_p)

    if Mp != M:
        out2 = out2[:M]
    return out2


def swiglu_pallas(x, w_uv, w_out, *, tm=None, th=None, vmem_limit_bytes=None):
    """
    Args:
      x:     (B, S, D)
      w_uv:  (D, 2*H)   -- PyTorch uv_proj.weight.T
      w_out: (H, D)     -- PyTorch out_proj.weight.T
    Returns:
      (B, S, D)
    """
    B, S, D = x.shape
    H = w_out.shape[0]
    assert w_uv.shape == (D, 2 * H)
    assert w_out.shape == (H, D)

    auto_tm, auto_th, auto_vmem = _auto_config(D)
    tm = auto_tm if tm is None else tm
    th = auto_th if th is None else th
    vmem_limit_bytes = auto_vmem if vmem_limit_bytes is None else vmem_limit_bytes

    x2 = x.reshape(B * S, D)
    out2 = _swiglu_impl(x2, w_uv, w_out, tm=tm, th=th,
                        vmem_limit_bytes=vmem_limit_bytes)
    return out2.reshape(B, S, D)


def reference_swiglu(x, w_uv, w_out):
    uv = jnp.einsum("bsd,dh->bsh", x, w_uv)
    H = w_out.shape[0]
    u, v = uv[..., :H], uv[..., H:]
    return jnp.einsum("bsh,hd->bsd", jax.nn.silu(u) * v, w_out)


if __name__ == "__main__":
    key = jax.random.PRNGKey(0)

    # ---- Test 1: module config dim=32, exp_factor=2 -> hidden=64 ------------
    dim, exp_factor = 32, 2
    hidden = dim * exp_factor
    batch, seq = 2, 8

    k_x, k_uv, k_out = jax.random.split(key, 3)
    x = jax.random.normal(k_x, (batch, seq, dim), dtype=jnp.float32)
    w_uv = jax.random.uniform(
        k_uv, (dim, 2 * hidden), dtype=jnp.float32,
        minval=-1.0 / (dim ** 0.5), maxval=1.0 / (dim ** 0.5))
    w_out = jax.random.uniform(
        k_out, (hidden, dim), dtype=jnp.float32,
        minval=-1.0 / (hidden ** 0.5), maxval=1.0 / (hidden ** 0.5))

    out = jax.block_until_ready(swiglu_pallas(x, w_uv, w_out))
    ref = reference_swiglu(x, w_uv, w_out)
    assert out.shape == (batch, seq, dim)
    assert jnp.allclose(out, ref, atol=1e-5, rtol=1e-5), "mismatch vs reference (single-h path)"

    # ---- Test 2: force the multi-h-step accumulator path --------------------
    dim2, exp2 = 128, 2
    hidden2 = dim2 * exp2  # 256
    k_x2, k_uv2, k_out2 = jax.random.split(jax.random.PRNGKey(0), 3)
    x2 = jax.random.normal(k_x2, (batch, seq, dim2), dtype=jnp.float32)
    w_uv2 = jax.random.uniform(
        k_uv2, (dim2, 2 * hidden2), dtype=jnp.float32,
        minval=-1.0 / (dim2 ** 0.5), maxval=1.0 / (dim2 ** 0.5))
    w_out2 = jax.random.uniform(
        k_out2, (hidden2, dim2), dtype=jnp.float32,
        minval=-1.0 / (hidden2 ** 0.5), maxval=1.0 / (hidden2 ** 0.5))

    out2 = jax.block_until_ready(swiglu_pallas(x2, w_uv2, w_out2, th=128))
    ref2 = reference_swiglu(x2, w_uv2, w_out2)
    assert out2.shape == (batch, seq, dim2)
    assert jnp.allclose(out2, ref2, atol=1e-4, rtol=1e-4), "mismatch vs reference (multi-h path)"

    print("KERNEL_OK")
</pallas_src>

<mosaic_0001>
module attributes {stable_mosaic.version = 11 : i64} {
  func.func @swiglu_kernel_single(%arg0: i32, %arg1: i32, %arg2: memref<8x32xf32, #tpu.memory_space<vmem>>, %arg3: memref<32x64xf32, #tpu.memory_space<vmem>>, %arg4: memref<32x64xf32, #tpu.memory_space<vmem>>, %arg5: memref<64x32xf32, #tpu.memory_space<vmem>>, %arg6: memref<8x32xf32, #tpu.memory_space<vmem>>) attributes {dimension_semantics = [#tpu.dimension_semantics<parallel>, #tpu.dimension_semantics<arbitrary>], iteration_bounds = array<i64: 2, 1>, scalar_prefetch = 0 : i64, scratch_operands = 0 : i64, tpu.core_type = #tpu.core_type<tc>, window_params = [{transform_indices = @transform_0, window_bounds = array<i64: 8, 32>}, {transform_indices = @transform_1, window_bounds = array<i64: 32, 64>}, {transform_indices = @transform_2, window_bounds = array<i64: 32, 64>}, {transform_indices = @transform_3, window_bounds = array<i64: 64, 32>}, {transform_indices = @transform_4, window_bounds = array<i64: 8, 32>}]} {
    %c0 = arith.constant 0 : index
    %c0_0 = arith.constant 0 : index
    %0 = vector.load %arg2[%c0, %c0_0] : memref<8x32xf32, #tpu.memory_space<vmem>>, vector<8x32xf32>
    %c0_1 = arith.constant 0 : index
    %c0_2 = arith.constant 0 : index
    %1 = vector.load %arg3[%c0_1, %c0_2] : memref<32x64xf32, #tpu.memory_space<vmem>>, vector<32x64xf32>
    %cst = arith.constant dense<0.000000e+00> : vector<8x64xf32>
    %2 = tpu.matmul %0, %1, %cst {dimension_numbers = #tpu.dot_dimension_numbers<[1], [0], [0], [1], [0, 0, 1, 1], [], []>} : vector<8x32xf32>, vector<32x64xf32>, vector<8x64xf32> -> vector<8x64xf32>
    %c0_3 = arith.constant 0 : index
    %c0_4 = arith.constant 0 : index
    %3 = vector.load %arg4[%c0_3, %c0_4] : memref<32x64xf32, #tpu.memory_space<vmem>>, vector<32x64xf32>
    %cst_5 = arith.constant dense<0.000000e+00> : vector<8x64xf32>
    %4 = tpu.matmul %0, %3, %cst_5 {dimension_numbers = #tpu.dot_dimension_numbers<[1], [0], [0], [1], [0, 0, 1, 1], [], []>} : vector<8x32xf32>, vector<32x64xf32>, vector<8x64xf32> -> vector<8x64xf32>
    %5 = arith.negf %2 : vector<8x64xf32>
    %6 = math.exp %5 : vector<8x64xf32>
    %cst_6 = arith.constant 1.000000e+00 : f32
    %7 = vector.broadcast %cst_6 : f32 to vector<8x64xf32>
    %8 = arith.addf %7, %6 : vector<8x64xf32>
    %9 = arith.divf %7, %8 : vector<8x64xf32>
    %10 = arith.mulf %2, %9 : vector<8x64xf32>
    %11 = arith.mulf %10, %4 : vector<8x64xf32>
    %c0_7 = arith.constant 0 : index
    %c0_8 = arith.constant 0 : index
    %12 = vector.load %arg5[%c0_7, %c0_8] : memref<64x32xf32, #tpu.memory_space<vmem>>, vector<64x32xf32>
    %cst_9 = arith.constant dense<0.000000e+00> : vector<8x32xf32>
    %13 = tpu.matmul %11, %12, %cst_9 {dimension_numbers = #tpu.dot_dimension_numbers<[1], [0], [0], [1], [0, 0, 1, 1], [], []>} : vector<8x64xf32>, vector<64x32xf32>, vector<8x32xf32> -> vector<8x32xf32>
    %c0_10 = arith.constant 0 : index
    %c0_11 = arith.constant 0 : index
    %14 = vector.load %arg6[%c0_10, %c0_11] : memref<8x32xf32, #tpu.memory_space<vmem>>, vector<8x32xf32>
    tpu.vector_store %arg6[%c0_10, %c0_11], %13 {strides = array<i32>} : memref<8x32xf32, #tpu.memory_space<vmem>>, vector<8x32xf32>,
    return
  }
  func.func @transform_0(%arg0: i32, %arg1: i32) -> (i32, i32) {
    %c0_i32 = arith.constant 0 : i32
    %c0_i32_0 = arith.constant 0 : i32
    return %arg0, %c0_i32 : i32, i32
  }
  func.func @transform_1(%arg0: i32, %arg1: i32) -> (i32, i32) {
    %c0_i32 = arith.constant 0 : i32
    %c0_i32_0 = arith.constant 0 : i32
    return %c0_i32, %arg1 : i32, i32
  }
  func.func @transform_2(%arg0: i32, %arg1: i32) -> (i32, i32) {
    %c0_i32 = arith.constant 0 : i32
    %c0_i32_0 = arith.constant 0 : i32
    return %c0_i32, %arg1 : i32, i32
  }
  func.func @transform_3(%arg0: i32, %arg1: i32) -> (i32, i32) {
    %c0_i32 = arith.constant 0 : i32
    %c0_i32_0 = arith.constant 0 : i32
    return %arg1, %c0_i32 : i32, i32
  }
  func.func @transform_4(%arg0: i32, %arg1: i32) -> (i32, i32) {
    %c0_i32 = arith.constant 0 : i32
    %c0_i32_0 = arith.constant 0 : i32
    return %arg0, %c0_i32 : i32, i32
  }
}

</mosaic_0001>

<bundles_post_ra>
// kernel: _swiglu_impl.1
= control target key start
LH: loop header
LB: loop body
LE: loop exit
PB: predicated region body
PF: predicated region fallthrough
CT: control target
= control target key end

     0   :  { %9 = vsyncpa [#allocation3], 0  ;;  %s1041_s0 = inlined_call_operand.vmem [shape: f32[16,32], index: 0, kind: input, shape index: {}]   ;;  %s1042_s1 = inlined_call_operand.vmem [shape: f32[32,64], index: 1, kind: input, shape index: {}]   ;;  %s1043_s2 = inlined_call_operand.vmem [shape: f32[32,64], index: 2, kind: input, shape index: {}]   ;;  %s1044_s3 = inlined_call_operand.vmem [shape: f32[64,32], index: 3, kind: input, shape index: {}]   ;;  %s1045_s4 = inlined_call_operand.hbm [shape: f32[16,32], index: 4, kind: output, shape index: {}]  }
   0x1   :  { %11 = vsyncpa [#allocation3 + $0x1], 0  ;;  %s876_s15 = smov 0   ;;  %s878_s16 = smov 0  }
   0x2   :  { %s880_s17 = smov 0   ;;  %s882_s18 = smov 0  }
   0x3   :  { %s884_s19 = smov 0   ;;  %s886_s20 = smov 0  }
   0x4 LB: > { %s631_s21 = sadd.s32 4294967295, %s846_s20   ;;  %s632_s22 = sadd.s32 4294967294, %s846_s20   ;;  %s846_s20 = sphi %s886_s20, %s17_s20   ;;  %s842_s19 = sphi %s884_s19, %s1052_s19   ;;  %s838_s18 = sphi %s882_s18, %s1051_s18   ;;  %s834_s17 = sphi %s880_s17, %s1050_s17   ;;  %s830_s16 = sphi %s878_s16, %s1049_s16   ;;  %s826_s15 = sphi %s876_s15, %s1048_s15  }
   0x5   : > { %s29_s23 = sadd.s32 1, %s842_s19  ;;  %s140_s24 = sadd.s32 1, %s834_s17 }
   0x6   : > { %p31_p0 = scmp.ge.s32.totalorder %s29_s23, 2  ;;  %p150_p1 = scmp.ne.s32.totalorder %s834_s17, %s830_s16 }
   0x7   : > { %p151_p2 = scmp.eq.s32.totalorder %s631_s21, 1  ;;  %p156_p3 = scmp.ne.s32.totalorder %s830_s16, %s826_s15 }
   0x8   : > { %s1054_s23 = smov (%p31_p0, %s29_s23), 0  ;;  %p157_p5 = scmp.eq.s32.totalorder %s632_s22, 1 }
   0x9   : > { %p916_p4 = por %p151_p2, %p150_p1  ;;  %s137_s26 = ssub.s32 %s842_s19, %s1054_s23 }
   0xa   : > { %p638_p6 = scmp.ge.s32.totalorder %s846_s20, 1  ;;  %p138_p7 = scmp.eq.s32.totalorder %s137_s26, 0 }
   0xb   : > { %p923_p8 = por %p157_p5, %p156_p3  ;;  %p205_p9 = scmp.lt.s32.totalorder %s846_s20, 3 }
   0xc   : > { %s929_s28 = scalar_select %p138_p7, %s834_s17, %s140_s24  }
   0xd   : > { %p206_p10 = pnand %p638_p6, %p205_p9 }
   0xe   : > { %p243_p11 = scmp.lt.s32.totalorder (!%p206_p10), %s838_s18, 1  ;;  %s240_s8 = sand.u32 (!%p206_p10), 1, %s830_s16  }
   0xf   : > { %209 = sbr.rel (%p206_p10) target bundleno = 465 (0x1d1), region = 36  ;;  %s639_s9 = sshll.u32 (!%p206_p10), %s240_s8, 3 }
  0x10   : > { %s242_s11 = scalar_lea.vmem (!%p206_p10), [#allocation2], %s639_s9  ;;  %s506_s22 = scalar_lea.sflag (!%p206_p10), [#allocation3], %s240_s8 }
  0x11   : > { %s519_s12 = sshll.u32 (!%p206_p10), %s242_s11, 4  ;;  %s996_s12 = int_to_ptr.vmem [resolvable:$true] %s519_s12 }
  0x12   : > { %s770_s24 = scalar_lea.vmem (!%p206_p10), %s996_s12, 128 }
  0x13   : > { %p771_p12 = scmp.ne.s32.totalorder (!%p206_p10), %s996_s12, %s770_s24 }
  0x14   : > { %v265_v0 = vld [vmem:[%s1042_s1 + $0x18] sm:$0xff]  ;;  %v848_v1 = vmov 0.0   ;;  %v264_v2 = vld [vmem:[%s1042_s1 + $0x10] sm:$0xff]  ;;  %vm849_vm0 = vmmov 0   ;;  %s244_s7 = scalar_select %p243_p11, %s838_s18, 1  ;;  %v263_v3 = vld [vmem:[%s1042_s1 + $0x8] sm:$0xff] }
  0x15   : > { %668 = vmatprep.subr.mxu1 %v848_v1  ;;  %676 = vmatprep.mubr.msk.f32.mxu1 %vm849_vm0, %v848_v1  ;;  %v262_v4 = vld [vmem:[%s1042_s1] sm:$0xff]  ;;  %vm266_vm1 = vcmask 261120   ;;  %v343_v6 = vld [vmem:[%s1043_s2 + $0x18] sm:$0xff]  ;;  %v342_v7 = vld [vmem:[%s1043_s2 + $0x10] sm:$0xff]  ;;  %vm430_vm2 = vcmask 523264   ;;  %p772_p13 = pnand %p771_p12, %p916_p4 }
  0x16   : > { %669 = vmatpush3.msra.mxu1 %v265_v0  ;;  %690 = vmatprep.subr.mxu0 %v848_v1  ;;  %s640_s10 = sshll.u32 %s244_s7, 3  ;;  %v341_v8 = vld [vmem:[%s1043_s2 + $0x8] sm:$0xff]  ;;  %v340_v9 = vld [vmem:[%s1043_s2] sm:$0xff]  ;;  %v429_v10 = vld [vmem:[%s1044_s3 + $0x38] sm:$0xff] }
  0x17   : > { %670 = vmatprep.subr.mxu1 %v848_v1  ;;  %706 = vmatprep.mubr.msk.f32.mxu0 %vm849_vm0, %v848_v1  ;;  %s246_s21 = scalar_lea.vmem %s1041_s0, %s640_s10  ;;  %v428_v11 = vld [vmem:[%s1044_s3 + $0x30] sm:$0xff]  ;;  %v427_v12 = vld [vmem:[%s1044_s3 + $0x28] sm:$0xff]  ;;  %v426_v13 = vld [vmem:[%s1044_s3 + $0x20] sm:$0xff]  ;;  %s646_s10 = sshll.u32 %s838_s18, 7 }
  0x18   : > { %671 = vmatpush3.msra.mxu1 %v264_v2  ;;  %v261_v5 = vld [vmem:[%s246_s21] sm:$0xff]  ;;  %691 = vmatpush3.msra.mxu0 %v429_v10  ;;  %v425_v14 = vld [vmem:[%s1044_s3 + $0x18] sm:$0xff]  ;;  %v424_v15 = vld [vmem:[%s1044_s3 + $0x10] sm:$0xff]  ;;  %s994_s21 = scalar_lea.hbm %s1045_s4, %s646_s10  ;;  %p773_p0 = pneg %p772_p13 }
  0x19   : > { %672 = vmatprep.subr.mxu1 %v848_v1  ;;  %692 = vmatprep.subr.mxu0 %v848_v1  ;;  %v423_v16 = vld [vmem:[%s1044_s3 + $0x8] sm:$0xff]  ;;  %v422_v17 = vld [vmem:[%s1044_s3] sm:$0xff]  ;;  %s850_s18 = smov [#allocation2]  }
  0x1a   : > { %673 = vmatpush3.msra.mxu1 %v263_v3  ;;  %693 = vmatpush3.msra.mxu0 %v428_v11  ;;  %s774_s26 = sshll.u32 %s850_s18, 4  ;;  %s775_s26 = int_to_ptr.vmem [resolvable:$false] %s774_s26 }
  0x1b   : > { %674 = vmatprep.subr.mxu1 %v848_v1  ;;  %694 = vmatprep.subr.mxu0 %v848_v1  ;;  %s776_s29 = scalar_lea.vmem %s775_s26, 256  ;;  %p777_p1 = scmp.lt.s32.totalorder %s996_s12, %s775_s26 }
  0x1c   : > { %675 = vmatpush3.msra.mxu1 %v262_v4  ;;  %695 = vmatpush3.msra.mxu0 %v427_v12  ;;  %p778_p2 = scmp.lt.s32.totalorder %s776_s29, %s770_s24 }
  0x1d   : > { %677 = vmatmul.mubr.msk.f32.vlgmr.msra.gmra.mxu1 %vm266_vm1, %v261_v5  ;;  %679 = vmatprep.subr.mxu1 %v848_v1 }
  0x1e   : > { %680 = vmatpush3.msra.mxu1 %v343_v6  ;;  %687 = vmatprep.mubr.msk.f32.mxu1 %vm849_vm0, %v848_v1  ;;  %p779_p3 = por %p778_p2, %p777_p1 }
  0x1f   : > { %681 = vmatprep.subr.mxu1 %v848_v1  ;;  %696 = vmatprep.subr.mxu0 %v848_v1 }
  0x20   : > { %682 = vmatpush3.msra.mxu1 %v342_v7  ;;  %697 = vmatpush3.msra.mxu0 %v426_v13  ;;  %p780_p5 = pnand %p779_p3, %p773_p0 }
  0x21   : > { %683 = vmatprep.subr.mxu1 %v848_v1  ;;  %698 = vmatprep.subr.mxu0 %v848_v1 }
  0x22   : > { %684 = vmatpush3.msra.mxu1 %v341_v8  ;;  %699 = vmatpush3.msra.mxu0 %v425_v14 }
  0x23   : > { %685 = vmatprep.subr.mxu1 %v848_v1  ;;  %700 = vmatprep.subr.mxu0 %v848_v1 }
  0x24   : > { %686 = vmatpush3.msra.mxu1 %v340_v9  ;;  %701 = vmatpush3.msra.mxu0 %v424_v15 }
  0x25   : > { %688 = vmatmul.mubr.msk.f32.vlgmr.msra.gmra.mxu1 %vm266_vm1, %v261_v5  ;;  %702 = vmatprep.subr.mxu0 %v848_v1 }
  0x26   : > { %703 = vmatpush3.msra.mxu0 %v423_v16 }
  0x27   : > { %704 = vmatprep.subr.mxu0 %v848_v1 }
  0x28   : > { %705 = vmatpush3.msra.mxu0 %v422_v17 }
  0xdd   : > { %v336_v18 = vpop.f32.mrf.mxu1 }
  0xde   : > { %v643_v19 = vmul.f32 -1.442695, %v336_v18 }
  0xdf   : > { %v678_v20 = vpop.f32.mrf.mxu1 }
  0xe0   : > { %766 = vpow2.f32 %v643_v19 }
  0xe5   : > { %v410_v21 = vpop.f32.mrf.mxu1 }
  0xe7   : > { %v689_v22 = vpop.f32.mrf.mxu1 }
  0xed   : > { %v767_v23 = vpop.eup %766 }
  0xee   : > { %v417_v24 = vadd.f32 1.0, %v767_v23 }
  0xf0   : > { %768 = vrcp.f32 %v417_v24 }
  0xfd   : > { %v769_v25 = vpop.eup %768 }
  0xfe   : > { %v420_v26 = vmul.f32 %v769_v25, %v336_v18 }
 0x100   : > { %v421_v27 = vmul.f32 %v420_v26, %v410_v21 }
 0x102   : > { %707 = vmatmul.mubr.msk.f32.vlgmr.msra.gmra.mxu0 %vm430_vm2, %v421_v27 }
 0x1c2   : > { %v500_v28 = vpop.f32.mrf.mxu0 }
 0x1c3   : > { %504 = vst.msk [vmem:[%s242_s11] sm:$0xff] %vm266_vm1, %v500_v28 }
 0x1c4   : > { %v708_v29 = vpop.f32.mrf.mxu0 }
 0x1c5   : > { %783 = shalt.err (!%p780_p5)
}
 0x1c6   : > { %s784_s30 = scalar_lea.hbm %s994_s21, 128  ;;  %s788_s7 = scalar_lea.hbm %s1045_s4, 256 }
 0x1c7   : > { %p785_p6 = scmp.ne.s32.totalorder %s994_s21, %s784_s30  ;;  %p789_p10 = scmp.lt.s32.totalorder %s994_s21, %s1045_s4 }
 0x1c8   : > { %p790_p11 = scmp.lt.s32.totalorder %s788_s7, %s784_s30 }
 0x1c9   : > { %p786_p7 = pnand %p785_p6, %p916_p4 }
 0x1ca   : > { %p791_p12 = por %p790_p11, %p789_p10 }
 0x1cb   : > { %p787_p9 = pneg %p786_p7 }
 0x1cd   : > { %p792_p13 = pnand %p791_p12, %p787_p9 }
 0x1cf   : > { %795 = shalt.err (!%p792_p13)
}
 0x1d0   : > { %709 = dma.vmem_to_hbm [thread:$0]  (%p916_p4), %s996_s12, 128, %s994_s21, %s506_s22  }
 0x1d1 PF: > { %p715_p0 = scmp.ge.s32.totalorder %s846_s20, 2  ;;  %s531_s10 = sand.u32 1, %s826_s15  }
 0x1d2   : > { %s532_s11 = scalar_lea.sflag [#allocation3], %s531_s10 }
 0x1d3   : > { %p712_p1 = pnand %p715_p0, %p923_p8 }
 0x1d5   : > { %p713_p2 = pneg %p712_p1 }
 0x1d7   : > { %821 = dma.done.wait (%p713_p2), %s532_s11, 128  }
 0x1d8   : > { %823 = vsyncadd (%p713_p2), %s532_s11, 4294967168  ;;  %s17_s20 = sadd.s32 1, %s846_s20   ;;  %s1048_s15 = smov %s830_s16 }
 0x1d9   : > { %p14_p3 = scmp.ge.s32.totalorder %s17_s20, 4   ;;  %s1049_s16 = smov %s834_s17 }
 0x1da   : > { %s1050_s17 = smov %s929_s28  ;;  %s1051_s18 = smov %s842_s19 }
 0x1db   : > { %s1052_s19 = smov %s1054_s23  ;;  %16 = sbr.rel (!%p14_p3) target bundleno = 4 (0x4), region = 80 }
 0x1e0   :  { %537 = vsyncpa [#allocation3], 1 }
 0x1e1   :  { %539 = vsyncpa [#allocation3 + $0x1], 1 }

</bundles_post_ra>
